<compile_context>
chip_gen: v6e
topology: v6e:2x2x1
jax: 0.10.0
libtpu: 0.0.40
codegen_flags: <defaults>
</compile_context>

<pallas_src>
import jax
import jax.numpy as jnp
from jax.experimental import pallas as pl
from jax.experimental.pallas import tpu as pltpu


D_IN = 1024  # Linear(1024, 1) is hard-coded in the module


def _round_up(x, m):
    return ((x + m - 1) // m) * m


def _nls_kernel(xi_ref, xj_ref, w_ref, b_ref, o_ref):
    # xi_ref, xj_ref : (TB, D) VMEM tiles in the caller's dtype (f32 or bf16)
    # w_ref          : (1, D)  f32 VMEM tile (broadcast over batch)
    # b_ref          : (1,)    f32 SMEM scalar
    # o_ref          : (TB, 1) f32 VMEM tile
    xi = xi_ref[...].astype(jnp.float32)
    xj = xj_ref[...].astype(jnp.float32)
    # TODO(synk): on v7x with bf16 streaming the EUP exp slot can become
    # co-critical with DMA; computing exp in bf16 (packed vreg, half the EUP
    # pushes) would fix that at ~1e-3 relative error — not adopted, f32 exp is
    # kept for exactness and v5e compatibility (no bf16 VPU/EUP there).
    e = jnp.exp(xi - xj)                                   # EUP
    # Weighted lane-reduction == Linear(D, 1) without bias (VPU mul + XLU
    # reduce; deliberately NOT an N=1 MXU matmul).
    s = jnp.sum(e * w_ref[...], axis=-1, keepdims=True)    # (TB, 1)
    s = s + b_ref[0]                                       # SMEM scalar bias
    o_ref[...] = jax.nn.sigmoid(s)


def nonlinear_similarity(xi, xj, weight, bias, *, tb=None):
    """xi, xj: [B, 1024] (f32 or bf16); weight: [1, 1024]; bias: [1].

    Returns sigmoid(exp(xi - xj) @ weight.T + bias) as [B, 1] f32.
    """
    B, D = xi.shape
    assert D == D_IN and xj.shape == (B, D)
    itemsize = jnp.dtype(xi.dtype).itemsize

    # --- tile selection -----------------------------------------------------
    # Size the double-buffered input working set to ~16 MiB:
    #   2 inputs x 2 buffers x tb x D x itemsize  ->  tb = 1024 (f32), 2048 (bf16)
    if tb is None:
        tb = (16 * 1024 * 1024) // (4 * D * itemsize)
    tb = max(8, min(int(tb), 2048))
    tb -= tb % 8                       # sublane constraint
    if B <= 8:
        # One full-extent block (second-last block dim == array dim) — legal
        # even when B is not a multiple of 8.
        tb = B
    else:
        tb = min(tb, _round_up(B, 8))
        # Keep >= 2 grid steps so the ("parallel",) batch axis can span both
        # TensorCores on v7x (single-TC v5e/v6e are unaffected).
        if pl.cdiv(B, tb) < 2:
            tb = max(8, _round_up(pl.cdiv(B, 2), 8))

    n_steps = pl.cdiv(B, tb)

    # Tiny parameters: cast once (negligible), keep compute in f32.
    weight2d = weight.reshape(1, D).astype(jnp.float32)
    bias1d = bias.reshape(1).astype(jnp.float32)

    # Scoped-VMEM budget: double-buffered inputs + headroom, capped well under
    # v7x's 64 MiB physical VMEM (and above v5e's 16 MiB default scoped limit).
    in_buf_bytes = 2 * 2 * tb * D * itemsize
    vmem_limit = int(min(max(32 * 1024 * 1024, in_buf_bytes + (8 * 1024 * 1024)),
                         48 * 1024 * 1024))

    cost = pl.CostEstimate(
        flops=3 * B * D,
        transcendentals=B * D + B,
        bytes_accessed=2 * B * D * itemsize + D * 4 + 4 + B * 4,
    )

    return pl.pallas_call(
        _nls_kernel,
        out_shape=jax.ShapeDtypeStruct((B, 1), jnp.float32),
        # Ragged last block when B % tb != 0: the out-of-range rows of the last
        # input tile hold undefined data (their exp may be Inf/NaN), but there
        # is no cross-row reduction and their output rows are masked on
        # writeback, so results are unaffected.  No padded copies of xi/xj.
        grid=(n_steps,),
        in_specs=[
            pl.BlockSpec((tb, D), lambda i: (i, 0)),    # xi tile (caller dtype)
            pl.BlockSpec((tb, D), lambda i: (i, 0)),    # xj tile (caller dtype)
            pl.BlockSpec((1, D), lambda i: (0, 0)),     # weight (shared, VMEM)
            pl.BlockSpec(memory_space=pltpu.MemorySpace.SMEM),  # bias scalar
        ],
        out_specs=pl.BlockSpec((tb, 1), lambda i: (i, 0)),
        compiler_params=pltpu.CompilerParams(
            dimension_semantics=("parallel",),   # megacore-shardable batch axis
            vmem_limit_bytes=vmem_limit,
        ),
        cost_estimate=cost,
    )(xi, xj, weight2d, bias1d)


def _reference(xi, xj, weight, bias):
    e = jnp.exp(xi.astype(jnp.float32) - xj.astype(jnp.float32))
    return jax.nn.sigmoid(e @ weight.reshape(-1, 1) + bias)


if __name__ == "__main__":
    key = jax.random.PRNGKey(0)
    k_xi, k_xj, k_w, k_b = jax.random.split(key, 4)

    B = 16
    xi = jax.random.normal(k_xi, (B, D_IN), dtype=jnp.float32) * 0.1
    xj = jax.random.normal(k_xj, (B, D_IN), dtype=jnp.float32) * 0.1

    # Deterministic nn.Linear(1024, 1)-style init: U(-1/sqrt(D), 1/sqrt(D)).
    bound = 1.0 / (D_IN ** 0.5)
    weight = jax.random.uniform(k_w, (1, D_IN), minval=-bound, maxval=bound,
                                dtype=jnp.float32)
    bias = jax.random.uniform(k_b, (1,), minval=-bound, maxval=bound,
                              dtype=jnp.float32)

    # 1) f32 inputs, default (dtype-aware) tile -> clamps to a 2-step grid.
    out = jax.block_until_ready(nonlinear_similarity(xi, xj, weight, bias))
    ref = _reference(xi, xj, weight, bias)
    assert out.shape == (B, 1)
    assert jnp.allclose(out, ref, atol=1e-5, rtol=1e-5)

    # 2) multi-step grid with a non-divisible batch (ragged last block,
    #    no padding copies).
    B2 = 20
    xi2 = jax.random.normal(k_xi, (B2, D_IN), dtype=jnp.float32) * 0.1
    xj2 = jax.random.normal(k_xj, (B2, D_IN), dtype=jnp.float32) * 0.1
    out2 = jax.block_until_ready(
        nonlinear_similarity(xi2, xj2, weight, bias, tb=8))
    ref2 = _reference(xi2, xj2, weight, bias)
    assert out2.shape == (B2, 1)
    assert jnp.allclose(out2, ref2, atol=1e-5, rtol=1e-5)

    # 3) bf16 inputs stream straight into the kernel (no wrapper f32 cast);
    #    kernel upcasts in-register, so it matches an f32 ref on rounded inputs.
    xi_bf, xj_bf = xi.astype(jnp.bfloat16), xj.astype(jnp.bfloat16)
    out3 = jax.block_until_ready(
        nonlinear_similarity(xi_bf, xj_bf, weight, bias))
    ref3 = _reference(xi_bf, xj_bf, weight, bias)
    assert out3.shape == (B, 1)
    assert jnp.allclose(out3, ref3, atol=1e-4, rtol=1e-4)

    print("KERNEL_OK")
</pallas_src>

<mosaic_0001>
module attributes {stable_mosaic.version = 11 : i64} {
  func.func @_nls_kernel(%arg0: i32, %arg1: memref<8x1024xf32, #tpu.memory_space<vmem>>, %arg2: memref<8x1024xf32, #tpu.memory_space<vmem>>, %arg3: memref<1x1024xf32, #tpu.memory_space<vmem>>, %arg4: memref<1xf32, #tpu.memory_space<smem>>, %arg5: memref<8x1xf32, #tpu.memory_space<vmem>>) attributes {dimension_semantics = [#tpu.dimension_semantics<parallel>], iteration_bounds = array<i64: 2>, scalar_prefetch = 0 : i64, scratch_operands = 0 : i64, tpu.core_type = #tpu.core_type<tc>, window_params = [{transform_indices = @transform_0, window_bounds = array<i64: 8, 1024>}, {transform_indices = @transform_1, window_bounds = array<i64: 8, 1024>}, {pipeline_mode = #tpu.pipeline_mode<synchronous>, transform_indices = @transform_2, window_bounds = array<i64: 1, 1024>}, {transform_indices = @transform_3, window_bounds = array<i64: 1>}, {transform_indices = @transform_4, window_bounds = array<i64: 8, 1>}]} {
    %c0 = arith.constant 0 : index
    %c0_0 = arith.constant 0 : index
    %0 = vector.load %arg1[%c0, %c0_0] : memref<8x1024xf32, #tpu.memory_space<vmem>>, vector<8x1024xf32>
    %c0_1 = arith.constant 0 : index
    %c0_2 = arith.constant 0 : index
    %1 = vector.load %arg2[%c0_1, %c0_2] : memref<8x1024xf32, #tpu.memory_space<vmem>>, vector<8x1024xf32>
    %2 = arith.subf %0, %1 : vector<8x1024xf32>
    %3 = math.exp %2 : vector<8x1024xf32>
    %c0_3 = arith.constant 0 : index
    %c0_4 = arith.constant 0 : index
    %4 = vector.load %arg3[%c0_3, %c0_4] : memref<1x1024xf32, #tpu.memory_space<vmem>>, vector<1x1024xf32>
    %5 = vector.broadcast %4 : vector<1x1024xf32> to vector<8x1024xf32>
    %6 = arith.mulf %3, %5 : vector<8x1024xf32>
    %cst = arith.constant dense<0.000000e+00> : vector<8xf32>
    %7 = vector.multi_reduction <add>, %6, %cst [1] : vector<8x1024xf32> to vector<8xf32>
    %8 = vector.shape_cast %7 : vector<8xf32> to vector<8x1xf32>
    %c0_5 = arith.constant 0 : index
    %9 = memref.load %arg4[%c0_5] : memref<1xf32, #tpu.memory_space<smem>>
    %10 = vector.broadcast %9 : f32 to vector<8x1xf32>
    %11 = arith.addf %8, %10 : vector<8x1xf32>
    %12 = arith.negf %11 : vector<8x1xf32>
    %13 = math.exp %12 : vector<8x1xf32>
    %cst_6 = arith.constant 1.000000e+00 : f32
    %14 = vector.broadcast %cst_6 : f32 to vector<8x1xf32>
    %15 = arith.addf %14, %13 : vector<8x1xf32>
    %16 = arith.divf %14, %15 : vector<8x1xf32>
    %c0_7 = arith.constant 0 : index
    %c0_8 = arith.constant 0 : index
    %17 = vector.load %arg5[%c0_7, %c0_8] : memref<8x1xf32, #tpu.memory_space<vmem>>, vector<8x1xf32>
    tpu.vector_store %arg5[%c0_7, %c0_8], %16 {strides = array<i32>} : memref<8x1xf32, #tpu.memory_space<vmem>>, vector<8x1xf32>,
    return
  }
  func.func @transform_0(%arg0: i32) -> (i32, i32) {
    %c0_i32 = arith.constant 0 : i32
    %c0_i32_0 = arith.constant 0 : i32
    return %arg0, %c0_i32 : i32, i32
  }
  func.func @transform_1(%arg0: i32) -> (i32, i32) {
    %c0_i32 = arith.constant 0 : i32
    %c0_i32_0 = arith.constant 0 : i32
    return %arg0, %c0_i32 : i32, i32
  }
  func.func @transform_2(%arg0: i32) -> (i32, i32) {
    %c0_i32 = arith.constant 0 : i32
    %c0_i32_0 = arith.constant 0 : i32
    %c0_i32_1 = arith.constant 0 : i32
    return %c0_i32, %c0_i32_0 : i32, i32
  }
  func.func @transform_3(%arg0: i32) -> i32 {
    %c0_i32 = arith.constant 0 : i32
    %c0_i32_0 = arith.constant 0 : i32
    return %c0_i32 : i32
  }
  func.func @transform_4(%arg0: i32) -> (i32, i32) {
    %c0_i32 = arith.constant 0 : i32
    %c0_i32_0 = arith.constant 0 : i32
    return %arg0, %c0_i32 : i32, i32
  }
}

</mosaic_0001>

<bundles_post_ra>
// kernel: tpu_custom_call.1
= control target key start
LH: loop header
LB: loop body
LE: loop exit
PB: predicated region body
PF: predicated region fallthrough
CT: control target
= control target key end

     0   :  { %s893_s0 = inlined_call_operand.hbm [shape: f32[16,1024], index: 0, kind: input, shape index: {}]   ;;  %s894_s1 = inlined_call_operand.hbm [shape: f32[16,1024], index: 1, kind: input, shape index: {}]   ;;  %s895_s2 = inlined_call_operand.hbm [shape: f32[1,1024], index: 2, kind: input, shape index: {}]   ;;  %s896_s3 = inlined_call_operand.<no memory space> [shape: f32[1], index: 3, kind: input, shape index: {}]   ;;  %s897_s4 = inlined_call_operand.vmem [shape: f32[16,1], index: 4, kind: output, shape index: {}]  }
   0x1   :  { %9 = sst [smem:[#allocation2]] %s896_s3 }
   0x2   :  { %10 = vsyncpa [#allocation4], 0 }
   0x3   :  { %12 = vsyncpa [#allocation4 + $0x1], 0 }
   0x4   :  { %13 = vsyncpa [#allocation6], 0 }
   0x5   :  { %15 = vsyncpa [#allocation6 + $0x1], 0  ;;  %s724_s17 = smov 0   ;;  %s726_s18 = smov 0  }
   0x6   :  { %s728_s19 = smov 0   ;;  %s730_s20 = smov 0  }
   0x7 LB: > { %s743_s3 = sadd.s32 4294967295, %s691_s20   ;;  %p41_p0 = scmp.ne.s32.totalorder %s683_s18, %s679_s17  ;;  %s691_s20 = sphi %s730_s20, %s913_s20   ;;  %s687_s19 = sphi %s728_s19, %s912_s19   ;;  %s683_s18 = sphi %s726_s18, %s911_s18   ;;  %s679_s17 = sphi %s724_s17, %s910_s17  }
   0x8   : > { %p898_p1 = scmp.eq.s32.totalorder %s743_s3, 0  ;;  %p473_p2 = scmp.ge.s32.totalorder %s691_s20, 1 }
   0x9   : > { %p146_p3 = scmp.lt.s32.totalorder %s691_s20, 3  ;;  %s693_s23 = smov [#allocation7]  }
   0xa   : > { %p751_p4 = por %p898_p1, %p41_p0  ;;  %s159_s24 = sshll.u32 %s693_s23, 4  ;;  %s160_s24 = int_to_ptr.vmem [resolvable:$true] %s159_s24 }
   0xb   : > { %p755_p5 = pnand %p473_p2, %p146_p3  ;;  %s762_s25 = sadd.s32 1, %s691_s20  }
   0xc   : > { %s901_s21 = scalar_select %p751_p4, 1, 0 }
   0xd   : > { %s902_s22 = scalar_select %p755_p5, 1, 0 }
   0xe   : > { %p500_p6 = pneg %p755_p5  ;;  %s25_s27 = ssub.s32 %s691_s20, %s762_s25 }
   0xf   : > { %p772_p8 = scmp.eq.s32.totalorder %s25_s27, 0  ;;  %s28_s29 = sadd.s32 1, %s687_s19 }
  0x10   : > { %p766_p7 = pnand %p500_p6, %p898_p1  ;;  %p35_p9 = scmp.ne.s32.totalorder %s687_s19, %s683_s18 }
  0x11   : > { %s578_s30 = scalar_lea.vmem %s160_s24, 128  ;;  %p586_p0 = scmp.lt.s32.totalorder %s160_s24, %s160_s24 }
  0x12   : > { %p569_p10 = pneg %p766_p7  ;;  %p579_p11 = scmp.ne.s32.totalorder %s160_s24, %s578_s30 }
  0x13   : > { %p587_p2 = scmp.lt.s32.totalorder %s578_s30, %s578_s30 }
  0x14   : > { %p581_p12 = pnand %p579_p11, %p569_p10 }
  0x15   : > { %p588_p3 = por %p587_p2, %p586_p0 }
  0x16   : > { %p582_p13 = pneg %p581_p12 }
  0x18   : > { %p589_p6 = pnand %p588_p3, %p582_p13 }
  0x1a   : > { %592 = shalt.err (!%p589_p6)
}
  0x1b   : > { %503 = dma.hbm_to_vmem [thread:$0]  (!%p766_p7), %s895_s2, 128, %s160_s24, [#allocation6]  }
  0x1c   : > { %s789_s7 = scalar_select %p772_p8, %s687_s19, %s28_s29  }
  0x1d   : > { %p36_p10 = scmp.eq.s32.totalorder %s691_s20, 0  ;;  %p512_p11 = scmp.lt.s32.totalorder %s691_s20, 2 }
  0x1e   : > { %s173_s8 = sand.u32 1, %s687_s19   ;;  %s490_s9 = sshll.u32 %s691_s20, 10 }
  0x1f   : > { %p37_p12 = por %p36_p10, %p35_p9  ;;  %s798_s10 = sshll.u32 %s173_s8, 6 }
  0x20   : > { %s805_s13 = scalar_lea.hbm %s893_s0, %s490_s9  ;;  %s177_s15 = scalar_lea.vmem [#allocation3], %s798_s10 }
  0x21   : > { %p807_p7 = pnand %p512_p11, %p37_p12  ;;  %s185_s16 = sshll.u32 %s177_s15, 4  ;;  %s186_s16 = int_to_ptr.vmem [resolvable:$true] %s185_s16 }
  0x22   : > { %s174_s17 = scalar_lea.sflag [#allocation4], %s173_s8  ;;  %s593_s23 = scalar_lea.hbm %s805_s13, 1024 }
  0x23   : > { %p594_p8 = scmp.ne.s32.totalorder %s805_s13, %s593_s23  ;;  %p595_p9 = pneg %p807_p7 }
  0x24   : > { %s598_s27 = scalar_lea.hbm %s893_s0, 2048  ;;  %p599_p2 = scmp.lt.s32.totalorder %s805_s13, %s893_s0 }
  0x25   : > { %p596_p13 = pnand %p595_p9, %p594_p8  ;;  %p600_p3 = scmp.lt.s32.totalorder %s598_s27, %s593_s23 }
  0x27   : > { %p597_p0 = pneg %p596_p13  ;;  %p601_p6 = por %p600_p3, %p599_p2 }
  0x29   : > { %p602_p10 = pnand %p601_p6, %p597_p0 }
  0x2b   : > { %605 = shalt.err (!%p602_p10)
}
  0x2c   : > { %s606_s30 = scalar_lea.vmem %s186_s16, 1024  ;;  %s694_s5 = smov [#allocation3]  }
  0x2d   : > { %p607_p11 = scmp.ne.s32.totalorder %s186_s16, %s606_s30  ;;  %s611_s6 = sshll.u32 %s694_s5, 4  ;;  %s612_s6 = int_to_ptr.vmem [resolvable:$false] %s611_s6 }
  0x2e   : > { %s613_s8 = scalar_lea.vmem %s612_s6, 2048  ;;  %p614_p13 = scmp.lt.s32.totalorder %s186_s16, %s612_s6 }
  0x2f   : > { %p609_p12 = pnand %p607_p11, %p595_p9  ;;  %p615_p1 = scmp.lt.s32.totalorder %s613_s8, %s606_s30 }
  0x31   : > { %p610_p8 = pneg %p609_p12  ;;  %p616_p4 = por %p615_p1, %p614_p13 }
  0x33   : > { %p617_p5 = pnand %p616_p4, %p610_p8 }
  0x35   : > { %620 = shalt.err (!%p617_p5)
}
  0x36   : > { %507 = dma.hbm_to_vmem [thread:$0]  (!%p807_p7), %s805_s13, 1024, %s186_s16, %s174_s17  }
  0x37   : > { %s837_s15 = scalar_lea.hbm %s894_s1, %s490_s9  ;;  %s192_s23 = sand.u32 1, %s691_s20  }
  0x38   : > { %s196_s24 = scalar_lea.vmem [#allocation5], %s798_s10  ;;  %s193_s27 = scalar_lea.sflag [#allocation6], %s192_s23 }
  0x39   : > { %s204_s26 = sshll.u32 %s196_s24, 4  ;;  %s621_s28 = scalar_lea.hbm %s837_s15, 1024  ;;  %s205_s26 = int_to_ptr.vmem [resolvable:$true] %s204_s26 }
  0x3a   : > { %p622_p1 = scmp.ne.s32.totalorder %s837_s15, %s621_s28  ;;  %s626_s17 = scalar_lea.hbm %s894_s1, 2048 }
  0x3b   : > { %p627_p0 = scmp.lt.s32.totalorder %s837_s15, %s894_s1  ;;  %p628_p2 = scmp.lt.s32.totalorder %s626_s17, %s621_s28 }
  0x3c   : > { %p624_p4 = pnand %p622_p1, %p595_p9 }
  0x3d   : > { %p629_p3 = por %p628_p2, %p627_p0 }
  0x3e   : > { %p625_p5 = pneg %p624_p4 }
  0x40   : > { %p630_p6 = pnand %p629_p3, %p625_p5 }
  0x42   : > { %633 = shalt.err (!%p630_p6)
}
  0x43   : > { %s634_s20 = scalar_lea.vmem %s205_s26, 1024  ;;  %s695_s10 = smov [#allocation5]  }
  0x44   : > { %p635_p10 = scmp.ne.s32.totalorder %s205_s26, %s634_s20  ;;  %s639_s30 = sshll.u32 %s695_s10, 4  ;;  %s640_s30 = int_to_ptr.vmem [resolvable:$false] %s639_s30 }
  0x45   : > { %s641_s5 = scalar_lea.vmem %s640_s30, 2048  ;;  %p642_p8 = scmp.lt.s32.totalorder %s205_s26, %s640_s30 }
  0x46   : > { %p637_p11 = pnand %p635_p10, %p595_p9  ;;  %p643_p13 = scmp.lt.s32.totalorder %s641_s5, %s634_s20 }
  0x48   : > { %p638_p12 = pneg %p637_p11  ;;  %p644_p1 = por %p643_p13, %p642_p8 }
  0x4a   : > { %p645_p4 = pnand %p644_p1, %p638_p12 }
  0x4c   : > { %648 = shalt.err (!%p645_p4)
}
  0x4d   : > { %510 = dma.hbm_to_vmem [thread:$0]  (!%p807_p7), %s837_s15, 1024, %s205_s26, %s193_s27  }
  0x4e   : > { %p906_p5 = scmp.ne.s32.totalorder %s902_s22, 0 }
  0x4f   : > { %s215_s6 = sand.u32 (!%p906_p5), 1, %s683_s18   ;;  %p907_p9 = scmp.ne.s32.totalorder (!%p906_p5), %s901_s21, 0 }
  0x50   : > { %213 = sbr.rel (%p906_p5) target bundleno = 303 (0x12f), region = 36  ;;  %s483_s8 = sshll.u32 (!%p906_p5), %s215_s6, 6 }
  0x51   : > { %s216_s11 = scalar_lea.sflag (!%p906_p5), [#allocation4], %s215_s6  ;;  %s219_s12 = scalar_lea.vmem (!%p906_p5), [#allocation3], %s483_s8 }
  0x55   : > { %666 = dma.done.wait (%p907_p9), %s216_s11, 1024  }
  0x56   : > { %668 = vsyncadd (%p907_p9), %s216_s11, 4294966272  ;;  %s224_s23 = sand.u32 1, %s743_s3   ;;  %s228_s24 = scalar_lea.vmem [#allocation5], %s483_s8 }
  0x57   : > { %s225_s14 = scalar_lea.sflag [#allocation6], %s224_s23 }
  0x58   : > { %670 = dma.done.wait (%p907_p9), %s225_s14, 1024  }
  0x59   : > { %672 = vsyncadd (%p907_p9), %s225_s14, 4294966272  ;;  %p908_p7 = scmp.eq.s32.totalorder %s743_s3, 0 }
  0x5b   : > { %674 = dma.done.wait (%p908_p7), [#allocation6], 128   ;;  %p909_p0 = pmov %p908_p7 }
  0x5c   : > { %v265_v0 = vld [vmem:[%s219_s12] sm:$0xff]  ;;  %v266_v1 = vld [vmem:[%s219_s12 + $0x8] sm:$0xff]  ;;  %v267_v2 = vld [vmem:[%s219_s12 + $0x10] sm:$0xff]  ;;  %v307_v23 = vlaneseq  ;;  %s364_s21 = sld [smem:[#allocation2]]  ;;  %p261_p2 = scmp.lt.s32.totalorder %s743_s3, 1  ;;  %vm373_vm0 = vcmask 7168  }
  0x5d   : > { %676 = vsyncadd (%p909_p0), [#allocation6], 4294967168  ;;  %v268_v3 = vld [vmem:[%s219_s12 + $0x18] sm:$0xff]  ;;  %v269_v4 = vld [vmem:[%s219_s12 + $0x20] sm:$0xff] }
  0x5e   : > { %v270_v5 = vld [vmem:[%s219_s12 + $0x28] sm:$0xff]  ;;  %v271_v6 = vld [vmem:[%s219_s12 + $0x30] sm:$0xff]  ;;  %v273_v7 = vld [vmem:[%s228_s24] sm:$0xff]  ;;  %v308_v31 = vshrl.u32 %v307_v23, 7  ;;  %s915_s3 = smov (!%p261_p2, %s743_s3), 1 }
  0x5f   : > { %v274_v8 = vld [vmem:[%s228_s24 + $0x8] sm:$0xff]  ;;  %v275_v9 = vld [vmem:[%s228_s24 + $0x10] sm:$0xff]  ;;  %v276_v10 = vld [vmem:[%s228_s24 + $0x18] sm:$0xff]  ;;  %v281_v11 = vsub.f32 %v265_v0, %v273_v7  ;;  %s486_s22 = sshll.u32 %s915_s3, 3 }
  0x60   : > { %v277_v12 = vld [vmem:[%s228_s24 + $0x20] sm:$0xff]  ;;  %v278_v13 = vld [vmem:[%s228_s24 + $0x28] sm:$0xff]  ;;  %v279_v14 = vld [vmem:[%s228_s24 + $0x30] sm:$0xff]  ;;  %v282_v15 = vsub.f32 %v266_v1, %v274_v8  ;;  %v283_v16 = vsub.f32 %v267_v2, %v275_v9  ;;  %v284_v17 = vsub.f32 %v268_v3, %v276_v10  ;;  %v309_v34 = vsub.s32 0, %v308_v31  ;;  %s264_s27 = scalar_lea.vmem %s897_s4, %s486_s22 }
  0x61   : > { %v272_v18 = vld [vmem:[%s219_s12 + $0x38] sm:$0xff]  ;;  %v285_v20 = vsub.f32 %v269_v4, %v277_v12  ;;  %v286_v21 = vsub.f32 %v270_v5, %v278_v13  ;;  %v289_v22 = vmul.f32 1.442695, %v281_v11  ;;  %v287_v24 = vsub.f32 %v271_v6, %v279_v14  ;;  %v305_v35 = vld [vmem:[#allocation7] sm:$0xff] }
  0x62   : > { %v280_v19 = vld [vmem:[%s228_s24 + $0x38] sm:$0xff]  ;;  %v291_v25 = vmul.f32 1.442695, %v282_v15  ;;  %v293_v26 = vmul.f32 1.442695, %v283_v16  ;;  %v313_v36 = vsub.s32 1, %v308_v31  ;;  %v310_v39 = vrot.slane %v305_v35, %v309_v34 }
  0x63   : > { %v295_v27 = vmul.f32 1.442695, %v284_v17  ;;  %547 = vpow2.f32 %v289_v22  ;;  %v297_v28 = vmul.f32 1.442695, %v285_v20  ;;  %v288_v29 = vsub.f32 %v272_v18, %v280_v19 }
  0x64   : > { %549 = vpow2.f32 %v291_v25  ;;  %v299_v30 = vmul.f32 1.442695, %v286_v21  ;;  %v301_v32 = vmul.f32 1.442695, %v287_v24  ;;  %v317_v37 = vsub.s32 2, %v308_v31 }
  0x65   : > { %551 = vpow2.f32 %v293_v26  ;;  %v303_v33 = vmul.f32 1.442695, %v288_v29  ;;  %v321_v38 = vsub.s32 3, %v308_v31  ;;  %v314_v40 = vrot.slane %v305_v35, %v313_v36 }
  0x66   : > { %553 = vpow2.f32 %v295_v27  ;;  %v325_v41 = vsub.s32 4, %v308_v31  ;;  %v318_v42 = vrot.slane %v305_v35, %v317_v37  ;;  %v329_v45 = vsub.s32 5, %v308_v31 }
  0x67   : > { %555 = vpow2.f32 %v297_v28  ;;  %v322_v44 = vrot.slane %v305_v35, %v321_v38  ;;  %v333_v50 = vsub.s32 6, %v308_v31  ;;  %v337_v56 = vsub.s32 7, %v308_v31 }
  0x68   : > { %557 = vpow2.f32 %v299_v30  ;;  %v326_v49 = vrot.slane %v305_v35, %v325_v41  ;;  %v330_v55 = vrot.slane %v305_v35, %v329_v45  ;;  %v365_v10 = vstv %s364_s21 }
  0x69   : > { %559 = vpow2.f32 %v301_v32  ;;  %v334_v60 = vrot.slane %v305_v35, %v333_v50  ;;  %v338_v0 = vrot.slane %v305_v35, %v337_v56 }
  0x6a   : > { %561 = vpow2.f32 %v303_v33 }
  0x70   : > { %v548_v43 = vpop.eup %547 }
  0x71   : > { %v550_v46 = vpop.eup %549  ;;  %v347_v47 = vmul.f32 %v548_v43, %v310_v39 }
  0x72   : > { %v552_v48 = vpop.eup %551  ;;  %v348_v51 = vmul.f32 %v550_v46, %v314_v40 }
  0x73   : > { %v554_v52 = vpop.eup %553  ;;  %v349_v53 = vmul.f32 %v552_v48, %v318_v42 }
  0x74   : > { %v556_v54 = vpop.eup %555  ;;  %v350_v57 = vmul.f32 %v554_v52, %v322_v44  ;;  %v355_v58 = vadd.f32 %v348_v51, %v347_v47 }
  0x75   : > { %v558_v59 = vpop.eup %557  ;;  %v351_v61 = vmul.f32 %v556_v54, %v326_v49 }
  0x76   : > { %v356_v62 = vadd.f32 %v355_v58, %v349_v53  ;;  %v560_v63 = vpop.eup %559  ;;  %v352_v1 = vmul.f32 %v558_v59, %v330_v55 }
  0x77   : > { %v562_v3 = vpop.eup %561  ;;  %v353_v4 = vmul.f32 %v560_v63, %v334_v60 }
  0x78   : > { %v357_v2 = vadd.f32 %v356_v62, %v350_v57  ;;  %v354_v6 = vmul.f32 %v562_v3, %v338_v0 }
  0x7a   : > { %v358_v5 = vadd.f32 %v357_v2, %v351_v61 }
  0x7c   : > { %v359_v7 = vadd.f32 %v358_v5, %v352_v1 }
  0x7e   : > { %v360_v8 = vadd.f32 %v359_v7, %v353_v4 }
  0x80   : > { %v361_v9 = vadd.f32 %v360_v8, %v354_v6 }
  0x82   : > { %362 = vadd.xlane.f32.xlu0 %v361_v9 }
 0x10b   : > { %v363_v11 = vpop.xlane.xlu0 %362 }
 0x10c   : > { %v366_v12 = vadd.f32 %v365_v10, %v363_v11 }
 0x10e   : > { %v487_v13 = vmul.f32 -1.442695, %v366_v12 }
 0x110   : > { %563 = vpow2.f32 %v487_v13 }
 0x11d   : > { %v564_v14 = vpop.eup %563 }
 0x11e   : > { %v370_v15 = vadd.f32 1.0, %v564_v14 }
 0x120   : > { %565 = vrcp.f32 %v370_v15 }
 0x12d   : > { %v566_v16 = vpop.eup %565 }
 0x12e   : > { %374 = vst.msk [vmem:[%s264_s27] sm:$0xff] %vm373_vm0, %v566_v16 }
 0x12f PF: > { %p18_p3 = scmp.ge.s32.totalorder %s762_s25, 4   ;;  %s910_s17 = smov %s683_s18 }
 0x130   : > { %s911_s18 = smov %s687_s19  ;;  %s912_s19 = smov %s789_s7 }
 0x131   : > { %s913_s20 = smov %s762_s25  ;;  %20 = sbr.rel (!%p18_p3) target bundleno = 7 (0x7), region = 93 }
 0x136   :  { %394 = vsyncpa [#allocation4], 1 }
 0x137   :  { %396 = vsyncpa [#allocation4 + $0x1], 1 }
 0x138   :  { %397 = vsyncpa [#allocation6], 1 }
 0x139   :  { %399 = vsyncpa [#allocation6 + $0x1], 1 }

</bundles_post_ra>
